<compile_context>
chip_gen: v7x
topology: tpu7x:2x2x1
jax: 0.10.0
libtpu: 0.0.40
codegen_flags: <defaults>
</compile_context>

<pallas_src>
import functools
import math

import jax
import jax.numpy as jnp
from jax import lax
from jax.experimental import pallas as pl
from jax.experimental.pallas import tpu as pltpu

LN_EPS = 1e-5      # PyTorch LayerNorm default
_LANES = 128
_SUBLANES = 8


def _round_up(x, m):
    return (x + m - 1) // m * m


def _residual_layer_kernel(xm_ref, xh_ref, mask_ref, w_ref, b_ref, g_ref,
                           beta_ref, o_ref, win_ref, *,
                           kernel_size, pad, tile_t, c_true, c_pad, halo_t):
    # xm_ref  : (1, tile_t, c_pad)    main input tile (zero-padded stream)
    # xh_ref  : (1, halo_t, c_pad)    K-1 (rounded to 8) halo rows from next tile
    # mask_ref: (1, tile_t, 1)
    # w_ref   : (K, c_pad, c_pad)     conv weight, tap-major, (C_in, C_out)
    # b_ref   : (1, c_pad)            conv bias (zero in padded lanes)
    # g_ref   : (1, c_pad)            LN gamma (zero in padded lanes)
    # beta_ref: (1, c_pad)            LN beta  (zero in padded lanes)
    # o_ref   : (1, tile_t, c_pad)
    # win_ref : VMEM scratch (tile_t + halo_t, c_pad), input dtype

    # Assemble the conv window once (aligned stores), touch input data once.
    win_ref[0:tile_t, :] = xm_ref[0]
    win_ref[tile_t:tile_t + halo_t, :] = xh_ref[0]

    # --- Conv1d (same padding) as K shifted (tile_t, C)x(C, C) MXU matmuls.
    # Operands go to the MXU in their native dtype; accumulate in f32.
    acc = jnp.zeros((tile_t, c_pad), jnp.float32)
    for k in range(kernel_size):                       # static unrolled taps
        acc += jnp.dot(win_ref[pl.ds(k, tile_t), :], w_ref[k],
                       preferred_element_type=jnp.float32)
    acc += b_ref[...].astype(jnp.float32)

    # --- exact (erf) GELU ---
    gelu = 0.5 * acc * (1.0 + lax.erf(acc * (1.0 / math.sqrt(2.0))))

    # --- dropout: eval mode -> identity ---

    # --- residual: same stream, offset by `pad` rows inside the window ---
    res = win_ref[pl.ds(pad, tile_t), :].astype(jnp.float32)
    h = res + gelu                                     # padded lanes are exactly 0

    # --- LayerNorm over the true C channels (last axis) ---
    mean = jnp.sum(h, axis=-1, keepdims=True) * (1.0 / c_true)
    centered = h - mean
    if c_pad != c_true:
        ch_valid = lax.broadcasted_iota(jnp.int32, (1, c_pad), 1) < c_true
        centered_m = jnp.where(ch_valid, centered, 0.0)
    else:
        centered_m = centered
    var = jnp.sum(centered_m * centered_m, axis=-1, keepdims=True) * (1.0 / c_true)
    hn = centered * lax.rsqrt(var + LN_EPS)
    out = hn * g_ref[...].astype(jnp.float32) + beta_ref[...].astype(jnp.float32)

    # --- mask (padded channel lanes already zero via gamma/beta padding) ---
    out = out * mask_ref[0].astype(jnp.float32)        # (tile_t, 1) broadcast
    o_ref[0] = out.astype(o_ref.dtype)


def residual_layer_ntc(x_ntc, mask_nt1, conv_w, conv_b, gamma, beta, *,
                       tile_t=1024):
    """NTC-native entry point (use this when stacking layers).

    x_ntc: (B, T, C); mask_nt1: (B, T, 1); conv_w: (C, C, K). Returns (B, T, C).
    """
    B, T, C = x_ntc.shape
    C_out, C_in, K = conv_w.shape
    assert C_out == C and C_in == C
    # PyTorch Conv1d(padding=K//2) with even K changes the output length and
    # the residual add would fail in the original module — require odd K.
    assert K % 2 == 1, "kernel_size must be odd"
    pad = K // 2

    halo_t = _round_up(max(K - 1, 1), _SUBLANES)        # >= K-1, multiple of 8
    tile = min(tile_t, _round_up(T, _SUBLANES))
    tile = _round_up(tile, halo_t)                      # halo blocks tile evenly
    n_t = -(-T // tile)
    T_out = n_t * tile
    L = T_out + halo_t                                  # padded input time length
    C_pad = max(_LANES, _round_up(C, _LANES))           # lane-dense channels

    # Single padded copy of the input: front conv pad + tail zeros + zero lanes.
    x_pad = jnp.pad(x_ntc, ((0, 0), (pad, L - pad - T), (0, C_pad - C)))
    mask_pad = jnp.pad(mask_nt1, ((0, 0), (0, T_out - T), (0, 0)))

    # conv weight (C_out, C_in, K) -> (K, C_in, C_out), zero-padded lanes.
    w_kcc = jnp.transpose(conv_w, (2, 1, 0))
    w_kcc = jnp.pad(w_kcc, ((0, 0), (0, C_pad - C), (0, C_pad - C)))
    b_1c = jnp.pad(conv_b, (0, C_pad - C)).reshape(1, C_pad)
    g_1c = jnp.pad(gamma, (0, C_pad - C)).reshape(1, C_pad)
    beta_1c = jnp.pad(beta, (0, C_pad - C)).reshape(1, C_pad)

    blocks_per_tile = tile // halo_t

    kernel = functools.partial(_residual_layer_kernel, kernel_size=K, pad=pad,
                               tile_t=tile, c_true=C, c_pad=C_pad,
                               halo_t=halo_t)

    out = pl.pallas_call(
        kernel,
        out_shape=jax.ShapeDtypeStruct((B, T_out, C_pad), x_ntc.dtype),
        grid_spec=pltpu.PrefetchScalarGridSpec(
            num_scalar_prefetch=0,
            grid=(B, n_t),
            in_specs=[
                # main tile of the (single) padded input stream
                pl.BlockSpec((1, tile, C_pad), lambda b, t: (b, t, 0)),
                # halo rows (start of the next tile) from the SAME array
                pl.BlockSpec((1, halo_t, C_pad),
                             lambda b, t: (b, (t + 1) * blocks_per_tile, 0)),
                pl.BlockSpec((1, tile, 1), lambda b, t: (b, t, 0)),
                pl.BlockSpec((K, C_pad, C_pad), lambda b, t: (0, 0, 0)),
                pl.BlockSpec((1, C_pad), lambda b, t: (0, 0)),
                pl.BlockSpec((1, C_pad), lambda b, t: (0, 0)),
                pl.BlockSpec((1, C_pad), lambda b, t: (0, 0)),
            ],
            out_specs=pl.BlockSpec((1, tile, C_pad), lambda b, t: (b, t, 0)),
            scratch_shapes=[pltpu.VMEM((tile + halo_t, C_pad), x_ntc.dtype)],
        ),
        compiler_params=pltpu.CompilerParams(
            dimension_semantics=("parallel", "parallel"),
            # Working set @ tile=1024 is a few MiB even at C_pad=512; 48 MiB
            # leaves headroom on every generation (v7x physical VMEM = 64 MiB).
            vmem_limit_bytes=48 * 1024 * 1024),
    )(x_pad, x_pad, mask_pad, w_kcc, b_1c, g_1c, beta_1c)

    return out[:, :T, :C]


def residual_layer(x_nct, mask_n1t, conv_w, conv_b, gamma, beta, *,
                   tile_t=1024):
    """PyTorch-interface wrapper: x_nct (B, C, T), mask_n1t (B, 1, T) -> (B, C, T)."""
    x_ntc = jnp.transpose(x_nct, (0, 2, 1))
    mask_nt1 = jnp.transpose(mask_n1t, (0, 2, 1))
    out_ntc = residual_layer_ntc(x_ntc, mask_nt1, conv_w, conv_b, gamma, beta,
                                 tile_t=tile_t)
    return jnp.transpose(out_ntc, (0, 2, 1))


def _reference(x_nct, mask_n1t, conv_w, conv_b, gamma, beta):
    """Pure-JAX reference of the PyTorch forward (eval mode, cond=None)."""
    K = conv_w.shape[-1]
    y = lax.conv_general_dilated(
        x_nct, conv_w, window_strides=(1,), padding=[(K // 2, K // 2)],
        dimension_numbers=("NCH", "OIH", "NCH"))
    y = y + conv_b[None, :, None]
    y = 0.5 * y * (1.0 + lax.erf(y / jnp.sqrt(2.0)))
    h = x_nct + y
    mean = jnp.mean(h, axis=1, keepdims=True)
    var = jnp.mean(jnp.square(h - mean), axis=1, keepdims=True)
    hn = (h - mean) / jnp.sqrt(var + LN_EPS)
    out = hn * gamma[None, :, None] + beta[None, :, None]
    return out * mask_n1t


if __name__ == "__main__":
    B, C, T, K = 2, 32, 40, 5
    key = jax.random.PRNGKey(0)
    k0, k1, k2, k3, k4 = jax.random.split(key, 5)

    x = jax.random.normal(k0, (B, C, T), dtype=jnp.float32)
    lengths = jnp.array([T, T - 7])
    mask = (jnp.arange(T)[None, None, :] < lengths[:, None, None]).astype(jnp.float32)

    # deterministic parameter init (Conv1d fan-in style)
    fan_in = C * K
    bound = 1.0 / math.sqrt(fan_in)
    conv_w = jax.random.uniform(k1, (C, C, K), minval=-bound, maxval=bound,
                                dtype=jnp.float32)
    conv_b = jax.random.uniform(k2, (C,), minval=-bound, maxval=bound,
                                dtype=jnp.float32)
    gamma = 1.0 + 0.1 * jax.random.normal(k3, (C,), dtype=jnp.float32)
    beta = 0.1 * jax.random.normal(k4, (C,), dtype=jnp.float32)

    ref = _reference(x, mask, conv_w, conv_b, gamma, beta)

    # multi-tile path: tile_t=16 -> 3 time tiles, exercises the halo BlockSpec
    out_multi = jax.block_until_ready(
        residual_layer(x, mask, conv_w, conv_b, gamma, beta, tile_t=16))
    assert jnp.allclose(out_multi, ref, atol=1e-4, rtol=1e-4), "mismatch (multi-tile)"

    # default path: single time tile
    out_single = jax.block_until_ready(
        residual_layer(x, mask, conv_w, conv_b, gamma, beta))
    assert jnp.allclose(out_single, ref, atol=1e-4, rtol=1e-4), "mismatch (single tile)"

    print("KERNEL_OK")
</pallas_src>

<mosaic_0001>
module attributes {stable_mosaic.version = 11 : i64} {
  func.func @_residual_layer_kernel(%arg0: i32, %arg1: i32, %arg2: memref<1x16x128xf32, #tpu.memory_space<vmem>>, %arg3: memref<1x8x128xf32, #tpu.memory_space<vmem>>, %arg4: memref<1x16x1xf32, #tpu.memory_space<vmem>>, %arg5: memref<5x128x128xf32, #tpu.memory_space<vmem>>, %arg6: memref<1x128xf32, #tpu.memory_space<vmem>>, %arg7: memref<1x128xf32, #tpu.memory_space<vmem>>, %arg8: memref<1x128xf32, #tpu.memory_space<vmem>>, %arg9: memref<1x16x128xf32, #tpu.memory_space<vmem>>, %arg10: memref<24x128xf32, #tpu.memory_space<vmem>>) attributes {dimension_semantics = [#tpu.dimension_semantics<parallel>, #tpu.dimension_semantics<parallel>], iteration_bounds = array<i64: 2, 3>, scalar_prefetch = 0 : i64, scratch_operands = 1 : i64, tpu.core_type = #tpu.core_type<tc>, window_params = [{transform_indices = @transform_0, window_bounds = array<i64: 1, 16, 128>}, {transform_indices = @transform_1, window_bounds = array<i64: 1, 8, 128>}, {transform_indices = @transform_2, window_bounds = array<i64: 1, 16, 1>}, {pipeline_mode = #tpu.pipeline_mode<synchronous>, transform_indices = @transform_3, window_bounds = array<i64: 5, 128, 128>}, {pipeline_mode = #tpu.pipeline_mode<synchronous>, transform_indices = @transform_4, window_bounds = array<i64: 1, 128>}, {pipeline_mode = #tpu.pipeline_mode<synchronous>, transform_indices = @transform_5, window_bounds = array<i64: 1, 128>}, {pipeline_mode = #tpu.pipeline_mode<synchronous>, transform_indices = @transform_6, window_bounds = array<i64: 1, 128>}, {transform_indices = @transform_7, window_bounds = array<i64: 1, 16, 128>}]} {
    %c0 = arith.constant 0 : index
    %c0_0 = arith.constant 0 : index
    %c0_1 = arith.constant 0 : index
    %0 = vector.load %arg2[%c0, %c0_0, %c0_1] : memref<1x16x128xf32, #tpu.memory_space<vmem>>, vector<1x16x128xf32>
    %1 = vector.shape_cast %0 : vector<1x16x128xf32> to vector<16x128xf32>
    %c0_2 = arith.constant 0 : index
    %c0_3 = arith.constant 0 : index
    %2 = vector.load %arg10[%c0_2, %c0_3] : memref<24x128xf32, #tpu.memory_space<vmem>>, vector<16x128xf32>
    tpu.vector_store %arg10[%c0_2, %c0_3], %1 {strides = array<i32>} : memref<24x128xf32, #tpu.memory_space<vmem>>, vector<16x128xf32>,
    %c0_4 = arith.constant 0 : index
    %c0_5 = arith.constant 0 : index
    %c0_6 = arith.constant 0 : index
    %3 = vector.load %arg3[%c0_4, %c0_5, %c0_6] : memref<1x8x128xf32, #tpu.memory_space<vmem>>, vector<1x8x128xf32>
    %4 = vector.shape_cast %3 : vector<1x8x128xf32> to vector<8x128xf32>
    %c16 = arith.constant 16 : index
    %c0_7 = arith.constant 0 : index
    %5 = vector.load %arg10[%c16, %c0_7] : memref<24x128xf32, #tpu.memory_space<vmem>>, vector<8x128xf32>
    tpu.vector_store %arg10[%c16, %c0_7], %4 {strides = array<i32>} : memref<24x128xf32, #tpu.memory_space<vmem>>, vector<8x128xf32>,
    %cst = arith.constant 0.000000e+00 : f32
    %6 = vector.broadcast %cst : f32 to vector<16x128xf32>
    %c0_8 = arith.constant 0 : index
    %c0_9 = arith.constant 0 : index
    %7 = vector.load %arg10[%c0_8, %c0_9] : memref<24x128xf32, #tpu.memory_space<vmem>>, vector<16x128xf32>
    %c0_10 = arith.constant 0 : index
    %c0_11 = arith.constant 0 : index
    %c0_12 = arith.constant 0 : index
    %8 = vector.load %arg5[%c0_10, %c0_11, %c0_12] : memref<5x128x128xf32, #tpu.memory_space<vmem>>, vector<1x128x128xf32>
    %9 = vector.shape_cast %8 : vector<1x128x128xf32> to vector<128x128xf32>
    %cst_13 = arith.constant dense<0.000000e+00> : vector<16x128xf32>
    %10 = tpu.matmul %7, %9, %cst_13 {dimension_numbers = #tpu.dot_dimension_numbers<[1], [0], [0], [1], [0, 0, 1, 1], [], []>} : vector<16x128xf32>, vector<128x128xf32>, vector<16x128xf32> -> vector<16x128xf32>
    %11 = arith.addf %6, %10 : vector<16x128xf32>
    %c1 = arith.constant 1 : index
    %c0_14 = arith.constant 0 : index
    %12 = vector.load %arg10[%c1, %c0_14] : memref<24x128xf32, #tpu.memory_space<vmem>>, vector<16x128xf32>
    %c1_15 = arith.constant 1 : index
    %c0_16 = arith.constant 0 : index
    %c0_17 = arith.constant 0 : index
    %13 = vector.load %arg5[%c1_15, %c0_16, %c0_17] : memref<5x128x128xf32, #tpu.memory_space<vmem>>, vector<1x128x128xf32>
    %14 = vector.shape_cast %13 : vector<1x128x128xf32> to vector<128x128xf32>
    %cst_18 = arith.constant dense<0.000000e+00> : vector<16x128xf32>
    %15 = tpu.matmul %12, %14, %cst_18 {dimension_numbers = #tpu.dot_dimension_numbers<[1], [0], [0], [1], [0, 0, 1, 1], [], []>} : vector<16x128xf32>, vector<128x128xf32>, vector<16x128xf32> -> vector<16x128xf32>
    %16 = arith.addf %11, %15 : vector<16x128xf32>
    %c2 = arith.constant 2 : index
    %c0_19 = arith.constant 0 : index
    %17 = vector.load %arg10[%c2, %c0_19] : memref<24x128xf32, #tpu.memory_space<vmem>>, vector<16x128xf32>
    %c2_20 = arith.constant 2 : index
    %c0_21 = arith.constant 0 : index
    %c0_22 = arith.constant 0 : index
    %18 = vector.load %arg5[%c2_20, %c0_21, %c0_22] : memref<5x128x128xf32, #tpu.memory_space<vmem>>, vector<1x128x128xf32>
    %19 = vector.shape_cast %18 : vector<1x128x128xf32> to vector<128x128xf32>
    %cst_23 = arith.constant dense<0.000000e+00> : vector<16x128xf32>
    %20 = tpu.matmul %17, %19, %cst_23 {dimension_numbers = #tpu.dot_dimension_numbers<[1], [0], [0], [1], [0, 0, 1, 1], [], []>} : vector<16x128xf32>, vector<128x128xf32>, vector<16x128xf32> -> vector<16x128xf32>
    %21 = arith.addf %16, %20 : vector<16x128xf32>
    %c3 = arith.constant 3 : index
    %c0_24 = arith.constant 0 : index
    %22 = vector.load %arg10[%c3, %c0_24] : memref<24x128xf32, #tpu.memory_space<vmem>>, vector<16x128xf32>
    %c3_25 = arith.constant 3 : index
    %c0_26 = arith.constant 0 : index
    %c0_27 = arith.constant 0 : index
    %23 = vector.load %arg5[%c3_25, %c0_26, %c0_27] : memref<5x128x128xf32, #tpu.memory_space<vmem>>, vector<1x128x128xf32>
    %24 = vector.shape_cast %23 : vector<1x128x128xf32> to vector<128x128xf32>
    %cst_28 = arith.constant dense<0.000000e+00> : vector<16x128xf32>
    %25 = tpu.matmul %22, %24, %cst_28 {dimension_numbers = #tpu.dot_dimension_numbers<[1], [0], [0], [1], [0, 0, 1, 1], [], []>} : vector<16x128xf32>, vector<128x128xf32>, vector<16x128xf32> -> vector<16x128xf32>
    %26 = arith.addf %21, %25 : vector<16x128xf32>
    %c4 = arith.constant 4 : index
    %c0_29 = arith.constant 0 : index
    %27 = vector.load %arg10[%c4, %c0_29] : memref<24x128xf32, #tpu.memory_space<vmem>>, vector<16x128xf32>
    %c4_30 = arith.constant 4 : index
    %c0_31 = arith.constant 0 : index
    %c0_32 = arith.constant 0 : index
    %28 = vector.load %arg5[%c4_30, %c0_31, %c0_32] : memref<5x128x128xf32, #tpu.memory_space<vmem>>, vector<1x128x128xf32>
    %29 = vector.shape_cast %28 : vector<1x128x128xf32> to vector<128x128xf32>
    %cst_33 = arith.constant dense<0.000000e+00> : vector<16x128xf32>
    %30 = tpu.matmul %27, %29, %cst_33 {dimension_numbers = #tpu.dot_dimension_numbers<[1], [0], [0], [1], [0, 0, 1, 1], [], []>} : vector<16x128xf32>, vector<128x128xf32>, vector<16x128xf32> -> vector<16x128xf32>
    %31 = arith.addf %26, %30 : vector<16x128xf32>
    %c0_34 = arith.constant 0 : index
    %c0_35 = arith.constant 0 : index
    %32 = vector.load %arg6[%c0_34, %c0_35] : memref<1x128xf32, #tpu.memory_space<vmem>>, vector<1x128xf32>
    %33 = vector.broadcast %32 : vector<1x128xf32> to vector<16x128xf32>
    %34 = arith.addf %31, %33 : vector<16x128xf32>
    %cst_36 = arith.constant 5.000000e-01 : f32
    %35 = vector.broadcast %cst_36 : f32 to vector<16x128xf32>
    %36 = arith.mulf %35, %34 : vector<16x128xf32>
    %cst_37 = arith.constant 0.707106769 : f32
    %37 = vector.broadcast %cst_37 : f32 to vector<16x128xf32>
    %38 = arith.mulf %34, %37 : vector<16x128xf32>
    %39 = math.erf %38 : vector<16x128xf32>
    %cst_38 = arith.constant 1.000000e+00 : f32
    %40 = vector.broadcast %cst_38 : f32 to vector<16x128xf32>
    %41 = arith.addf %40, %39 : vector<16x128xf32>
    %42 = arith.mulf %36, %41 : vector<16x128xf32>
    %c2_39 = arith.constant 2 : index
    %c0_40 = arith.constant 0 : index
    %43 = vector.load %arg10[%c2_39, %c0_40] : memref<24x128xf32, #tpu.memory_space<vmem>>, vector<16x128xf32>
    %44 = arith.addf %43, %42 : vector<16x128xf32>
    %cst_41 = arith.constant dense<0.000000e+00> : vector<16xf32>
    %45 = vector.multi_reduction <add>, %44, %cst_41 [1] : vector<16x128xf32> to vector<16xf32>
    %46 = vector.shape_cast %45 : vector<16xf32> to vector<16x1xf32>
    %cst_42 = arith.constant 3.125000e-02 : f32
    %47 = vector.broadcast %cst_42 : f32 to vector<16x1xf32>
    %48 = arith.mulf %46, %47 : vector<16x1xf32>
    %49 = vector.broadcast %48 : vector<16x1xf32> to vector<16x128xf32>
    %50 = arith.subf %44, %49 : vector<16x128xf32>
    %51 = tpu.iota {dimensions = array<i32: 1>} : vector<1x128xi32>
    %c32_i32 = arith.constant 32 : i32
    %52 = vector.broadcast %c32_i32 : i32 to vector<1x128xi32>
    %53 = arith.cmpi slt, %51, %52 : vector<1x128xi32>
    %cst_43 = arith.constant 0.000000e+00 : f32
    %54 = vector.shape_cast %53 : vector<1x128xi1> to vector<1x128xi1>
    %55 = vector.broadcast %54 : vector<1x128xi1> to vector<16x128xi1>
    %56 = vector.broadcast %cst_43 : f32 to vector<16x128xf32>
    %57 = arith.select %55, %50, %56 : vector<16x128xi1>, vector<16x128xf32>
    %58 = arith.mulf %57, %57 : vector<16x128xf32>
    %cst_44 = arith.constant dense<0.000000e+00> : vector<16xf32>
    %59 = vector.multi_reduction <add>, %58, %cst_44 [1] : vector<16x128xf32> to vector<16xf32>
    %60 = vector.shape_cast %59 : vector<16xf32> to vector<16x1xf32>
    %cst_45 = arith.constant 3.125000e-02 : f32
    %61 = vector.broadcast %cst_45 : f32 to vector<16x1xf32>
    %62 = arith.mulf %60, %61 : vector<16x1xf32>
    %cst_46 = arith.constant 9.99999974E-6 : f32
    %63 = vector.broadcast %cst_46 : f32 to vector<16x1xf32>
    %64 = arith.addf %62, %63 : vector<16x1xf32>
    %65 = math.rsqrt %64 : vector<16x1xf32>
    %66 = vector.broadcast %65 : vector<16x1xf32> to vector<16x128xf32>
    %67 = arith.mulf %50, %66 : vector<16x128xf32>
    %c0_47 = arith.constant 0 : index
    %c0_48 = arith.constant 0 : index
    %68 = vector.load %arg7[%c0_47, %c0_48] : memref<1x128xf32, #tpu.memory_space<vmem>>, vector<1x128xf32>
    %69 = vector.broadcast %68 : vector<1x128xf32> to vector<16x128xf32>
    %70 = arith.mulf %67, %69 : vector<16x128xf32>
    %c0_49 = arith.constant 0 : index
    %c0_50 = arith.constant 0 : index
    %71 = vector.load %arg8[%c0_49, %c0_50] : memref<1x128xf32, #tpu.memory_space<vmem>>, vector<1x128xf32>
    %72 = vector.broadcast %71 : vector<1x128xf32> to vector<16x128xf32>
    %73 = arith.addf %70, %72 : vector<16x128xf32>
    %c0_51 = arith.constant 0 : index
    %c0_52 = arith.constant 0 : index
    %c0_53 = arith.constant 0 : index
    %74 = vector.load %arg4[%c0_51, %c0_52, %c0_53] : memref<1x16x1xf32, #tpu.memory_space<vmem>>, vector<1x16x1xf32>
    %75 = vector.shape_cast %74 : vector<1x16x1xf32> to vector<16x1xf32>
    %76 = vector.broadcast %75 : vector<16x1xf32> to vector<16x128xf32>
    %77 = arith.mulf %73, %76 : vector<16x128xf32>
    %c0_54 = arith.constant 0 : index
    %c0_55 = arith.constant 0 : index
    %c0_56 = arith.constant 0 : index
    %78 = vector.load %arg9[%c0_54, %c0_55, %c0_56] : memref<1x16x128xf32, #tpu.memory_space<vmem>>, vector<1x16x128xf32>
    %79 = vector.shape_cast %78 : vector<1x16x128xf32> to vector<16x128xf32>
    %80 = vector.shape_cast %77 : vector<16x128xf32> to vector<1x16x128xf32>
    tpu.vector_store %arg9[%c0_54, %c0_55, %c0_56], %80 {strides = array<i32>} : memref<1x16x128xf32, #tpu.memory_space<vmem>>, vector<1x16x128xf32>,
    return
  }
  func.func @transform_0(%arg0: i32, %arg1: i32) -> (i32, i32, i32) {
    %c0_i32 = arith.constant 0 : i32
    %c0_i32_0 = arith.constant 0 : i32
    return %arg0, %arg1, %c0_i32 : i32, i32, i32
  }
  func.func @transform_1(%arg0: i32, %arg1: i32) -> (i32, i32, i32) {
    %c1_i32 = arith.constant 1 : i32
    %0 = arith.addi %arg1, %c1_i32 : i32
    %c2_i32 = arith.constant 2 : i32
    %1 = arith.muli %0, %c2_i32 : i32
    %c0_i32 = arith.constant 0 : i32
    %c0_i32_0 = arith.constant 0 : i32
    return %arg0, %1, %c0_i32 : i32, i32, i32
  }
  func.func @transform_2(%arg0: i32, %arg1: i32) -> (i32, i32, i32) {
    %c0_i32 = arith.constant 0 : i32
    %c0_i32_0 = arith.constant 0 : i32
    return %arg0, %arg1, %c0_i32 : i32, i32, i32
  }
  func.func @transform_3(%arg0: i32, %arg1: i32) -> (i32, i32, i32) {
    %c0_i32 = arith.constant 0 : i32
    %c0_i32_0 = arith.constant 0 : i32
    %c0_i32_1 = arith.constant 0 : i32
    %c0_i32_2 = arith.constant 0 : i32
    return %c0_i32, %c0_i32_0, %c0_i32_1 : i32, i32, i32
  }
  func.func @transform_4(%arg0: i32, %arg1: i32) -> (i32, i32) {
    %c0_i32 = arith.constant 0 : i32
    %c0_i32_0 = arith.constant 0 : i32
    %c0_i32_1 = arith.constant 0 : i32
    return %c0_i32, %c0_i32_0 : i32, i32
  }
  func.func @transform_5(%arg0: i32, %arg1: i32) -> (i32, i32) {
    %c0_i32 = arith.constant 0 : i32
    %c0_i32_0 = arith.constant 0 : i32
    %c0_i32_1 = arith.constant 0 : i32
    return %c0_i32, %c0_i32_0 : i32, i32
  }
  func.func @transform_6(%arg0: i32, %arg1: i32) -> (i32, i32) {
    %c0_i32 = arith.constant 0 : i32
    %c0_i32_0 = arith.constant 0 : i32
    %c0_i32_1 = arith.constant 0 : i32
    return %c0_i32, %c0_i32_0 : i32, i32
  }
  func.func @transform_7(%arg0: i32, %arg1: i32) -> (i32, i32, i32) {
    %c0_i32 = arith.constant 0 : i32
    %c0_i32_0 = arith.constant 0 : i32
    return %arg0, %arg1, %c0_i32 : i32, i32, i32
  }
}

</mosaic_0001>

<bundles_post_ra>
// kernel: tpu_custom_call.1
= control target key start
LH: loop header
LB: loop body
LE: loop exit
PB: predicated region body
PF: predicated region fallthrough
CT: control target
= control target key end

     0   :  { %s2377_s0 = inlined_call_operand.hbm [shape: f32[2,56,128], index: 0, kind: input, shape index: {}]   ;;  %s2378_s1 = inlined_call_operand.hbm [shape: f32[2,56,128], index: 1, kind: input, shape index: {}]   ;;  %s2379_s2 = inlined_call_operand.vmem [shape: f32[2,48,1], index: 2, kind: input, shape index: {}]   ;;  %s2380_s3 = inlined_call_operand.hbm [shape: f32[5,128,128], index: 3, kind: input, shape index: {}]   ;;  %s2381_s4 = inlined_call_operand.vmem [shape: f32[1,128], index: 4, kind: input, shape index: {}]   ;;  %s2382_s5 = inlined_call_operand.vmem [shape: f32[1,128], index: 5, kind: input, shape index: {}]   ;;  %s2383_s6 = inlined_call_operand.vmem [shape: f32[1,128], index: 6, kind: input, shape index: {}]   ;;  %s2384_s7 = inlined_call_operand.hbm [shape: f32[2,48,128], index: 7, kind: output, shape index: {}]  }
   0x1   :  { %2402 = sst [smem:[#allocation24_spill]] %s2379_s2 }
   0x2   :  { %2403 = sst [smem:[#allocation25_spill]] %s2380_s3 }
   0x3   :  { %2404 = sst [smem:[#allocation26_spill]] %s2382_s5 }
   0x4   :  { %2405 = sst [smem:[#allocation27_spill]] %s2383_s6 }
   0x5   :  { %2406 = sst [smem:[#allocation28_spill]] %s2384_s7 }
   0x6   :  { %12 = vsyncpa [#allocation4], 0 }
   0x7   :  { %14 = vsyncpa [#allocation4 + $0x1], 0 }
   0x8   :  { %15 = vsyncpa [#allocation7], 0 }
   0x9   :  { %17 = vsyncpa [#allocation7 + $0x1], 0 }
   0xa   :  { %18 = vsyncpa [#allocation5], 0 }
   0xb   :  { %20 = vsyncpa [#allocation5 + $0x1], 0  ;;  %s2019_s24 = smov 0   ;;  %s2021_s25 = smov 0  }
   0xc   :  { %s2023_s26 = smov 0   ;;  %s2025_s27 = smov 0  }
   0xd   :  { %s2027_s28 = smov 0   ;;  %s2029_s29 = smov 0  }
   0xe   :  { %s2031_s30 = smov 0   ;;  %s2033_s8 = smov 0  }
   0xf   :  { %s2035_s9 = smov 0   ;;  %s2037_s10 = smov 0  }
  0x10   :  { %s2039_s11 = smov 0  }
  0x11 LB: > { %2407 = sst [smem:[#allocation14_spill]] %s1938_s27  ;;  %s2075_s12 = sadd.s32 4294967295, %s1966_s11   ;;  %s1966_s11 = sphi %s2039_s11, %s26_s11   ;;  %s1962_s10 = sphi %s2037_s10, %s2458_s10   ;;  %s1958_s9 = sphi %s2035_s9, %s2457_s9   ;;  %s1954_s8 = sphi %s2033_s8, %s2456_s8   ;;  %s1950_s30 = sphi %s2031_s30, %s2448_s30   ;;  %s1946_s29 = sphi %s2029_s29, %s2447_s29   ;;  %s1942_s28 = sphi %s2027_s28, %s2455_s28   ;;  %s1938_s27 = sphi %s2025_s27, %s2454_s27   ;;  %s1934_s26 = sphi %s2023_s26, %s2453_s26   ;;  %s1930_s25 = sphi %s2021_s25, %s2452_s25   ;;  %s1926_s24 = sphi %s2019_s24, %s2451_s24  }
  0x12   : > { %2408 = sst [smem:[#allocation15_spill]] %s1946_s29  ;;  %s35_s14 = sadd.s32 1, %s1958_s9 }
  0x13   : > { %2409 = sst [smem:[#allocation16_spill]] %s1954_s8  ;;  %s38_s15 = sadd.s32 1, %s1962_s10 }
  0x14   : > { %2410 = sst [smem:[#allocation17_spill]] %s1958_s9  ;;  %p36_p0 = scmp.ge.s32.totalorder %s35_s14, 3 }
  0x15   : > { %s47_s16 = sadd.s32 1, %s1946_s29  ;;  %p54_p1 = scmp.ne.s32.totalorder %s1946_s29, %s1942_s28 }
  0x16   : > { %p55_p2 = scmp.eq.s32.totalorder %s1966_s11, 0  ;;  %s2460_s14 = smov (%p36_p0, %s35_s14), 0 }
  0x17   : > { %2411 = sst [smem:[#allocation18_spill]] %s2460_s14  ;;  %s2462_s15 = smov (!%p36_p0, %s38_s15), %s1962_s10 }
  0x18   : > { %s43_s17 = ssub.s32 %s1958_s9, %s2460_s14  ;;  %p2094_p3 = por %p55_p2, %p54_p1 }
  0x19   : > { %p40_p4 = scmp.ge.s32.totalorder %s2462_s15, 2  ;;  %p2388_p5 = scmp.ne.s32.totalorder %s1942_s28, %s1938_s27 }
  0x1a   : > { %s2412_s18 = scalar_select %p2094_p3, 1, 0 }
  0x1b   : > { %p2392_p6 = scmp.eq.s32.totalorder %s2075_s12, 0  ;;  %s2102_s19 = sshll.u32 %s1958_s9, 1 }
  0x1c   : > { %s2464_s15 = smov (%p40_p4, %s2462_s15), 0  ;;  %s1184_s21 = sadd.s32 2, %s2102_s19 }
  0x1d   : > { %2413 = sst [smem:[#allocation19_spill]] %s2464_s15  ;;  %p2111_p7 = por %p2392_p6, %p2388_p5 }
  0x1e   : > { %s42_s22 = ssub.s32 %s1962_s10, %s2464_s15  ;;  %s1185_s23 = sshll.u32 %s2460_s14, 1 }
  0x1f   : > { %s2414_s20 = scalar_select %p2111_p7, 1, 0 }
  0x20   : > { %s44_s13 = sor.u32 %s43_s17, %s42_s22  ;;  %s1186_s9 = sadd.s32 2, %s1185_s23 }
  0x21   : > { %p45_p8 = scmp.eq.s32.totalorder %s44_s13, 0  ;;  %s75_s7 = ssub.s32 %s1184_s21, %s1186_s9 }
  0x22   : > { %s76_s6 = sor.u32 %s75_s7, %s42_s22  ;;  %s79_s5 = sadd.s32 1, %s1934_s26 }
  0x23   : > { %s2121_s2 = scalar_select %p45_p8, %s1946_s29, %s47_s16  }
  0x24   : > { %p77_p9 = scmp.eq.s32.totalorder %s76_s6, 0  ;;  %p86_p10 = scmp.ne.s32.totalorder %s1934_s26, %s1930_s25 }
  0x25   : > { %2415 = sst [smem:[#allocation20_spill]] %s2121_s2  ;;  %p92_p11 = scmp.ne.s32.totalorder %s1930_s25, %s1926_s24 }
  0x26   : > { %p230_p12 = scmp.eq.s32.totalorder %s2075_s12, 5  ;;  %p2133_p13 = por %p86_p10, %p55_p2 }
  0x27   : > { %s2129_s15 = scalar_select %p77_p9, %s1934_s26, %s79_s5  }
  0x28   : > { %s2417_s17 = scalar_select %p2133_p13, 1, 0 }
  0x29   : > { %2416 = sst [smem:[#allocation21_spill]] %s2129_s15  ;;  %p2139_p0 = por %p92_p11, %p2392_p6 }
  0x2a   : > { %p2146_p4 = por %p230_p12, %p54_p1  ;;  %s2421_s6 = sadd.s32 4294967294, %s1966_s11  }
  0x2b   : > { %s2418_s13 = scalar_select %p2139_p0, 1, 0 }
  0x2c   : > { %s2419_s7 = scalar_select %p2146_p4, 1, 0 }
  0x2d   : > { %p236_p8 = scmp.eq.s32.totalorder %s2421_s6, 5  ;;  %p1155_p5 = scmp.ge.s32.totalorder %s1966_s11, 1 }
  0x2e   : > { %2420 = sst [smem:[#allocation22_spill]] %s2419_s7  ;;  %p243_p9 = scmp.lt.s32.totalorder %s1966_s11, 7 }
  0x2f   : > { %p2422_p7 = scmp.ne.s32.totalorder %s1942_s28, %s1938_s27  ;;  %s1968_s9 = smov [#allocation8]  }
  0x30   : > { %p2161_p2 = pnand %p1155_p5, %p243_p9  ;;  %s255_s16 = sshll.u32 %s1968_s9, 4  ;;  %s256_s16 = int_to_ptr.vmem [resolvable:$true] %s255_s16 }
  0x31   : > { %p2157_p3 = por %p236_p8, %p2422_p7  ;;  %s2427_s3 = sld [smem:[#allocation25_spill]] }
  0x32   : > { %s2425_s24 = scalar_select %p2161_p2, 1, 0 }
  0x33   : > { %s2423_s5 = scalar_select %p2157_p3, 1, 0 }
  0x34   : > { %p1632_p1 = pneg %p2161_p2 }
  0x35   : > { %2424 = sst [smem:[#allocation23_spill]] %s2423_s5 }
  0x36   : > { %p2169_p10 = pnand %p1632_p1, %p2392_p6 }
  0x37   : > { %s1749_s6 = scalar_lea.hbm %s2427_s3, 10240 }
  0x38   : > { %p1750_p5 = scmp.ne.s32.totalorder %s2427_s3, %s1749_s6  ;;  %p1751_p7 = pneg %p2169_p10 }
  0x39   : > { %p1756_p8 = scmp.lt.u32.totalorder %s1749_s6, %s2427_s3 }
  0x3a   : > { %p1752_p11 = pnand %p1751_p7, %p1750_p5 }
  0x3c   : > { %p1753_p12 = pneg %p1752_p11 }
  0x3e   : > { %p1758_p9 = pnand %p1756_p8, %p1753_p12 }
  0x40   : > { %1761 = shalt.err (!%p1758_p9)
}
  0x41   : > { %s1762_s5 = scalar_lea.vmem %s256_s16, 10240  ;;  %p1770_p4 = scmp.lt.s32.totalorder %s256_s16, %s256_s16 }
  0x42   : > { %p1763_p1 = scmp.ne.s32.totalorder %s256_s16, %s1762_s5  ;;  %p1771_p0 = scmp.lt.s32.totalorder %s1762_s5, %s1762_s5 }
  0x44   : > { %p1765_p6 = pnand %p1763_p1, %p1751_p7  ;;  %p1772_p2 = por %p1771_p0, %p1770_p4 }
  0x46   : > { %p1766_p3 = pneg %p1765_p6 }
  0x48   : > { %p1773_p13 = pnand %p1772_p2, %p1766_p3 }
  0x4a   : > { %1776 = shalt.err (!%p1773_p13)
}
  0x4b   : > { %s1969_s2 = smov 128   ;;  %s1970_s14 = smov 8  }
  0x4c   : > { %1635 = dma.hbm_to_vmem [thread:$0]  (!%p2169_p10), %s2427_s3, 10240, %s256_s16, [#allocation7], %s1969_s2, %s1969_s2, %s1970_s14  }
  0x4d   : > { %p1157_p5 = scmp.ge.s32.totalorder %s1966_s11, 6 }
  0x4e   : > { %p2428_p11 = scmp.ne.s32.totalorder (!%p1157_p5), %s2412_s18, 0 }
  0x4f   : > { %274 = sbr.rel (%p1157_p5) target bundleno = 143 (0x8f), region = 32 }
  0x56   : > { %277 = sbr.rel (!%p2428_p11) target bundleno = 115 (0x73), region = 36  ;;  %s278_s15 = sand.u32 (%p2428_p11), 1, %s1946_s29  }
  0x57   : > { %s1158_s5 = sshll.u32 (%p2428_p11), %s278_s15, 4  ;;  %s2193_s6 = scalar_lea.sflag (%p2428_p11), [#allocation4], %s278_s15 }
  0x58   : > { %s282_s9 = scalar_lea.vmem (%p2428_p11), [#allocation3], %s1158_s5  ;;  %s1620_s27 = smul.u32 (%p2428_p11), 7, %s1962_s10 }
  0x59   : > { %s297_s21 = sshll.u32 (%p2428_p11), %s282_s9, 4  ;;  %s1781_s29 = scalar_lea.hbm (%p2428_p11), %s2377_s0, 1792  ;;  %s2197_s21 = int_to_ptr.vmem [resolvable:$true] %s297_s21 }
  0x5a   : > { %s293_s7 = sadd.s32 (%p2428_p11), %s1620_s27, %s2102_s19 }
  0x5b   : > { %s1162_s16 = sshll.u32 (%p2428_p11), %s293_s7, 7 }
  0x5c   : > { %s295_s22 = scalar_lea.hbm (%p2428_p11), %s2377_s0, %s1162_s16 }
  0x5d   : > { %s1777_s18 = scalar_lea.hbm %s295_s22, 256  ;;  %p1782_p6 = scmp.lt.u32.totalorder %s295_s22, %s2377_s0 }
  0x5e   : > { %p1778_p3 = scmp.ne.s32.totalorder %s295_s22, %s1777_s18  ;;  %p1783_p13 = scmp.lt.u32.totalorder %s1781_s29, %s1777_s18 }
  0x5f   : > { %p1785_p4 = scmp.lt.u32.totalorder %s1777_s18, %s295_s22 }
  0x60   : > { %p1784_p0 = por %p1783_p13, %p1782_p6 }
  0x62   : > { %p1786_p2 = por %p1785_p4, %p1784_p0 }
  0x64   : > { %p1787_p10 = pnand %p1786_p2, %p1778_p3 }
  0x66   : > { %1790 = shalt.err (!%p1787_p10)
}
  0x67   : > { %s1791_s27 = scalar_lea.vmem %s2197_s21, 256  ;;  %s1971_s7 = smov [#allocation3]  }
  0x68   : > { %p1792_p7 = scmp.ne.s32.totalorder %s2197_s21, %s1791_s27  ;;  %s1795_s5 = sshll.u32 %s1971_s7, 4  ;;  %s1796_s5 = int_to_ptr.vmem [resolvable:$false] %s1795_s5 }
  0x69   : > { %s1797_s3 = scalar_lea.vmem %s1796_s5, 512  ;;  %p1798_p12 = scmp.lt.s32.totalorder %s2197_s21, %s1796_s5 }
  0x6a   : > { %p1799_p8 = scmp.lt.s32.totalorder %s1797_s3, %s1791_s27 }
  0x6c   : > { %p1800_p9 = por %p1799_p8, %p1798_p12 }
  0x6e   : > { %p1801_p1 = pnand %p1800_p9, %p1792_p7 }
  0x70   : > { %1804 = shalt.err (!%p1801_p1)
}
  0x71   : > { %s1972_s29 = smov 128   ;;  %s1973_s8 = smov 8  }
  0x72   : > { %303 = dma.hbm_to_vmem [thread:$0]  %s295_s22, 256, %s2197_s21, %s2193_s6, %s1972_s29, %s1972_s29, %s1973_s8  }
  0x73 PF: > { %s309_s9 = sand.u32 1, %s1934_s26   ;;  %s307_s16 = sand.u32 1, %s1966_s11  }
  0x74   : > { %s1165_s2 = sshll.u32 %s309_s9, 3  ;;  %s1049_s14 = smul.u32 7, %s1962_s10 }
  0x75   : > { %s311_s18 = scalar_lea.vmem [#allocation6], %s1165_s2  ;;  %s308_s22 = scalar_lea.sflag [#allocation7], %s307_s16 }
  0x76   : > { %s322_s23 = sshll.u32 %s311_s18, 4  ;;  %s1050_s15 = sadd.s32 %s2102_s19, %s1049_s14  ;;  %s2217_s23 = int_to_ptr.vmem [resolvable:$true] %s322_s23 }
  0x77   : > { %s1167_s27 = sshll.u32 %s1050_s15, 7  ;;  %p2429_p11 = scmp.ne.s32.totalorder %s2417_s17, 0 }
  0x78   : > { %s1052_s6 = scalar_lea.hbm %s2378_s1, %s1167_s27  ;;  %s1809_s9 = scalar_lea.hbm %s2378_s1, 1792 }
  0x79   : > { %s1053_s21 = scalar_lea.hbm %s1052_s6, 256  ;;  %s1833_s3 = scalar_lea.hbm %s1052_s6, 384 }
  0x7a   : > { %p1806_p5 = scmp.ne.s32.totalorder %s1053_s21, %s1833_s3  ;;  %p1810_p13 = scmp.lt.u32.totalorder %s1053_s21, %s2378_s1 }
  0x7b   : > { %p1811_p0 = scmp.lt.u32.totalorder %s1809_s9, %s1833_s3  ;;  %p1813_p2 = scmp.lt.u32.totalorder %s1833_s3, %s1053_s21 }
  0x7c   : > { %p1807_p3 = pnand %p1806_p5, %p2429_p11 }
  0x7d   : > { %p1812_p4 = por %p1811_p0, %p1810_p13 }
  0x7e   : > { %p1808_p6 = pneg %p1807_p3 }
  0x7f   : > { %p1814_p10 = por %p1813_p2, %p1812_p4 }
  0x81   : > { %p1815_p7 = pnand %p1814_p10, %p1808_p6 }
  0x83   : > { %1818 = shalt.err (!%p1815_p7)
}
  0x84   : > { %s1819_s16 = scalar_lea.vmem %s2217_s23, 128  ;;  %s1974_s14 = smov [#allocation6]  }
  0x85   : > { %p1820_p12 = scmp.ne.s32.totalorder %s2217_s23, %s1819_s16  ;;  %s1823_s18 = sshll.u32 %s1974_s14, 4  ;;  %s1824_s18 = int_to_ptr.vmem [resolvable:$false] %s1823_s18 }
  0x86   : > { %s1825_s15 = scalar_lea.vmem %s1824_s18, 256  ;;  %p1826_p1 = scmp.lt.s32.totalorder %s2217_s23, %s1824_s18 }
  0x87   : > { %p1821_p8 = pnand %p1820_p12, %p2429_p11  ;;  %p1827_p5 = scmp.lt.s32.totalorder %s1825_s15, %s1819_s16 }
  0x89   : > { %p1822_p9 = pneg %p1821_p8  ;;  %p1828_p3 = por %p1827_p5, %p1826_p1 }
  0x8b   : > { %p1829_p13 = pnand %p1828_p3, %p1822_p9 }
  0x8d   : > { %1832 = shalt.err (!%p1829_p13)
}
  0x8e   : > { %1625 = dma.hbm_to_vmem [thread:$0]  (%p2429_p11), %s1053_s21, 128, %s2217_s23, %s308_s22  }
  0x8f PF: > { %p2430_p6 = scmp.ne.s32.totalorder %s2425_s24, 0 }
  0x90   : > { %s2241_s27 = sand.u32 (!%p2430_p6), 1, %s1942_s28   ;;  %p2431_p0 = scmp.ne.s32.totalorder (!%p2430_p6), %s2414_s20, 0 }
  0x91   : > { %344 = sbr.rel (%p2430_p6) target bundleno = 834 (0x342), region = 48  ;;  %s1169_s7 = sshll.u32 (!%p2430_p6), %s2241_s27, 4 }
  0x92   : > { %s347_s5 = scalar_lea.sflag (!%p2430_p6), [#allocation4], %s2241_s27  ;;  %s2247_s6 = scalar_lea.vmem (!%p2430_p6), [#allocation3], %s1169_s7 }
  0x98   : > { %1907 = dma.done.wait (%p2431_p0), %s347_s5, 256  }
  0x99   : > { %1909 = vsyncadd (%p2431_p0), %s347_s5, 4294967040  ;;  %s355_s17 = sand.u32 1, %s2075_s12   ;;  %s357_s24 = sand.u32 1, %s1930_s25  }
  0x9a   : > { %s2255_s23 = sshll.u32 %s357_s24, 3  ;;  %s356_s21 = scalar_lea.sflag [#allocation7], %s355_s17 }
  0x9b   : > { %s359_s22 = scalar_lea.vmem [#allocation6], %s2255_s23  ;;  %p2432_p11 = scmp.ne.s32.totalorder %s2418_s13, 0 }
  0x9d   : > { %1911 = dma.done.wait (%p2432_p11), %s356_s21, 128  }
  0x9e   : > { %1913 = vsyncadd (%p2432_p11), %s356_s21, 4294967168  ;;  %p2433_p4 = scmp.eq.s32.totalorder %s2075_s12, 0 }
  0xa0   : > { %1915 = dma.done.wait (%p2433_p4), [#allocation7], 10240   ;;  %p2434_p2 = pmov %p2433_p4 }
  0xa1   : > { %v453_v0 = vld [vmem:[#allocation8 + $0x80] sm:$0xff]  ;;  %v454_v1 = vld [vmem:[#allocation8 + $0x88] sm:$0xff]  ;;  %v455_v5 = vld [vmem:[#allocation8 + $0x90] sm:$0xff]  ;;  %s2435_s13 = sld [smem:[#allocation16_spill]]  ;;  %s2290_s3 = sshll.u32 %s1950_s30, 1 }
  0xa2   : > { %1917 = vsyncadd (%p2434_p2), [#allocation7], 4294957056  ;;  %v622_v2 = vld [vmem:[#allocation8 + $0x100] sm:$0xff]  ;;  %v1452_v3 = vpack.c.bf16 %v454_v1, %v453_v0  ;;  %v623_v4 = vld [vmem:[#allocation8 + $0x108] sm:$0xff]  ;;  %p418_p7 = scmp.lt.s32.totalorder %s2290_s3, 5  ;;  %s2436_s18 = sld [smem:[#allocation24_spill]] }
  0xa3   : > { %v456_v6 = vld [vmem:[#allocation8 + $0x98] sm:$0xff]  ;;  %v1516_v7 = vpack.c.bf16 %v623_v4, %v622_v2  ;;  %v624_v9 = vld [vmem:[#allocation8 + $0x110] sm:$0xff]  ;;  %v457_v11 = vld [vmem:[#allocation8 + $0xa0] sm:$0xff]  ;;  %s2437_s17 = sld [smem:[#allocation26_spill]]  ;;  %s2438_s21 = sld [smem:[#allocation27_spill]] }
  0xa4   : > { %v1456_v8 = vpack.c.bf16 %v456_v6, %v455_v5  ;;  %v625_v10 = vld [vmem:[#allocation8 + $0x118] sm:$0xff]  ;;  %1453 = vmatprep.subr.bf16.mxu1 %v1452_v3  ;;  %v458_v13 = vld [vmem:[#allocation8 + $0xa8] sm:$0xff]  ;;  %v626_v14 = vld [vmem:[#allocation8 + $0x120] sm:$0xff]  ;;  %s419_s8 = scalar_select %p418_p7, %s2290_s3, 5 }
  0xa5   : > { %v1520_v12 = vpack.c.bf16 %v625_v10, %v624_v9  ;;  %v627_v15 = vld [vmem:[#allocation8 + $0x128] sm:$0xff]  ;;  %1517 = vmatprep.subr.bf16.mxu0 %v1516_v7  ;;  %1455 = vmatpush3.bf16.msra.mxu1 %v1452_v3  ;;  %v1460_v16 = vpack.c.bf16 %v458_v13, %v457_v11  ;;  %v459_v18 = vld [vmem:[#allocation8 + $0xb0] sm:$0xff]  ;;  %v460_v19 = vld [vmem:[#allocation8 + $0xb8] sm:$0xff]  ;;  %s2439_s12 = sld [smem:[#allocation22_spill]]  ;;  %s1976_s16 = smov [#allocation9]  }
  0xa6   : > { %1519 = vmatpush3.bf16.msra.mxu0 %v1516_v7  ;;  %1457 = vmatprep.subr.bf16.mxu1 %v1456_v8  ;;  %v1524_v17 = vpack.c.bf16 %v627_v15, %v626_v14  ;;  %v628_v20 = vld [vmem:[#allocation8 + $0x130] sm:$0xff]  ;;  %v629_v21 = vld [vmem:[#allocation8 + $0x138] sm:$0xff]  ;;  %v1464_v22 = vpack.c.bf16 %v460_v19, %v459_v18  ;;  %v461_v24 = vld [vmem:[#allocation8 + $0xc0] sm:$0xff]  ;;  %s1838_s14 = sshll.u32 %s1976_s16, 4  ;;  %s1839_s14 = int_to_ptr.vmem [resolvable:$false] %s1838_s14 }
  0xa7   : > { %1521 = vmatprep.subr.bf16.mxu0 %v1520_v12  ;;  %v1528_v23 = vpack.c.bf16 %v629_v21, %v628_v20  ;;  %v462_v25 = vld [vmem:[#allocation8 + $0xc8] sm:$0xff]  ;;  %v2267_v26 = vld [vmem:[%s2247_s6] sm:$0xff]  ;;  %v464_v34 = vld [vmem:[#allocation8 + $0xd8] sm:$0xff]  ;;  %p416_p10 = scmp.lt.s32.totalorder %s2435_s13, 1  ;;  %s1622_s30 = smul.u32 6, %s2435_s13 }
  0xa8   : > { %v630_v27 = vld [vmem:[#allocation8 + $0x140] sm:$0xff]  ;;  %v631_v28 = vld [vmem:[#allocation8 + $0x148] sm:$0xff]  ;;  %428 = vst [vmem:[#allocation2] sm:$0xff] %v2267_v26  ;;  %v430_v30 = vld [vmem:[%s359_s22] sm:$0xff]  ;;  %v1468_v31 = vpack.c.bf16 %v462_v25, %v461_v24 }
  0xa9   : > { %1459 = vmatpush3.bf16.msra.mxu1 %v1456_v8  ;;  %v2270_v29 = vld [vmem:[%s2247_s6 + $0x8] sm:$0xff]  ;;  %431 = vst [vmem:[#allocation2 + $0x10] sm:$0xff] %v430_v30  ;;  %v1532_v32 = vpack.c.bf16 %v631_v28, %v630_v27  ;;  %v463_v33 = vld [vmem:[#allocation8 + $0xd0] sm:$0xff]  ;;  %v465_v39 = vld [vmem:[#allocation8 + $0xe0] sm:$0xff]  ;;  %s417_s29 = scalar_select %p416_p10, %s2435_s13, 1 }
  0xaa   : > { %1523 = vmatpush3.bf16.msra.mxu0 %v1520_v12  ;;  %1461 = vmatprep.subr.bf16.mxu1 %v1460_v16  ;;  %429 = vst [vmem:[#allocation2 + $0x8] sm:$0xff] %v2270_v29  ;;  %v632_v35 = vld [vmem:[#allocation8 + $0x150] sm:$0xff]  ;;  %v633_v36 = vld [vmem:[#allocation8 + $0x158] sm:$0xff]  ;;  %v1472_v37 = vpack.c.bf16 %v464_v34, %v463_v33  ;;  %v466_v40 = vld [vmem:[#allocation8 + $0xe8] sm:$0xff]  ;;  %s1004_s22 = sadd.s32 %s1622_s30, %s2290_s3  ;;  %s407_s13 = scalar_lea.vmem [#allocation9], %s1169_s7 }
  0xab   : > { %1525 = vmatprep.subr.bf16.mxu0 %v1524_v17  ;;  %v1536_v38 = vpack.c.bf16 %v633_v36, %v632_v35  ;;  %v634_v41 = vld [vmem:[#allocation8 + $0x160] sm:$0xff]  ;;  %v635_v42 = vld [vmem:[#allocation8 + $0x168] sm:$0xff]  ;;  %v1476_v45 = vpack.c.bf16 %v466_v40, %v465_v39  ;;  %v467_v47 = vld [vmem:[#allocation8 + $0xf0] sm:$0xff]  ;;  %s1621_s9 = smul.u32 6, %s417_s29  ;;  %s1180_s20 = sshll.u32 %s1004_s22, 7 }
  0xac   : > { %v1540_v46 = vpack.c.bf16 %v635_v42, %v634_v41  ;;  %v468_v48 = vld [vmem:[#allocation8 + $0xf8] sm:$0xff]  ;;  %v636_v49 = vld [vmem:[#allocation8 + $0x170] sm:$0xff]  ;;  %v434_v53 = vld [vmem:[#allocation8] sm:$0xff]  ;;  %s1007_s29 = sshll.u32 %s407_s13, 4  ;;  %s992_s3 = scalar_lea.sflag [#allocation5], %s2241_s27  ;;  %s2314_s29 = int_to_ptr.vmem [resolvable:$true] %s1007_s29 }
  0xad   : > { %1463 = vmatpush3.bf16.msra.mxu1 %v1460_v16  ;;  %v637_v50 = vld [vmem:[#allocation8 + $0x178] sm:$0xff]  ;;  %v1480_v51 = vpack.c.bf16 %v468_v48, %v467_v47  ;;  %v435_v54 = vld [vmem:[#allocation8 + $0x8] sm:$0xff]  ;;  %v718_v55 = vld [vmem:[#allocation8 + $0x180] sm:$0xff]  ;;  %s421_s2 = sadd.s32 %s1621_s9, %s419_s8  ;;  %s1834_s7 = scalar_lea.vmem %s2314_s29, 256 }
  0xae   : > { %1527 = vmatpush3.bf16.msra.mxu0 %v1524_v17  ;;  %1465 = vmatprep.subr.bf16.mxu1 %v1464_v22  ;;  %v1544_v52 = vpack.c.bf16 %v637_v50, %v636_v49  ;;  %v719_v56 = vld [vmem:[#allocation8 + $0x188] sm:$0xff]  ;;  %v1484_v57 = vpack.c.bf16 %v435_v54, %v434_v53  ;;  %v436_v59 = vld [vmem:[#allocation8 + $0x10] sm:$0xff]  ;;  %v437_v60 = vld [vmem:[#allocation8 + $0x18] sm:$0xff]  ;;  %s1174_s19 = sshll.u32 %s421_s2, 3  ;;  %s2440_s2 = sld [smem:[#allocation28_spill]] }
  0xaf   : > { %1529 = vmatprep.subr.bf16.mxu0 %v1528_v23  ;;  %v1548_v58 = vpack.c.bf16 %v719_v56, %v718_v55  ;;  %v720_v61 = vld [vmem:[#allocation8 + $0x190] sm:$0xff]  ;;  %v721_v62 = vld [vmem:[#allocation8 + $0x198] sm:$0xff]  ;;  %v1488_v1 = vpack.c.bf16 %v437_v60, %v436_v59  ;;  %v438_v3 = vld [vmem:[#allocation8 + $0x20] sm:$0xff]  ;;  %s423_s15 = scalar_lea.vmem %s2436_s18, %s1174_s19  ;;  %p1835_p12 = scmp.ne.s32.totalorder %s2314_s29, %s1834_s7 }
  0xb0   : > { %v1552_v2 = vpack.c.bf16 %v721_v62, %v720_v61  ;;  %v439_v4 = vld [vmem:[#allocation8 + $0x28] sm:$0xff]  ;;  %v722_v5 = vld [vmem:[#allocation8 + $0x1a0] sm:$0xff]  ;;  %v440_v10 = vld [vmem:[#allocation8 + $0x30] sm:$0xff]  ;;  %p2441_p8 = scmp.ne.s32.totalorder %s2439_s12, 0  ;;  %s1840_s18 = scalar_lea.vmem %s1839_s14, 512 }
  0xb1   : > { %1467 = vmatpush3.bf16.msra.mxu1 %v1464_v22  ;;  %v450_v43 = vld [vmem:[#allocation2 + $0x1] sm:$0xff]  ;;  %v451_v63 = vld [vmem:[#allocation2 + $0x9] sm:$0xff]  ;;  %v1492_v8 = vpack.c.bf16 %v439_v4, %v438_v3  ;;  %v724_v12 = vld [vmem:[#allocation8 + $0x1b0] sm:$0xff]  ;;  %p1841_p5 = scmp.lt.s32.totalorder %s2314_s29, %s1839_s14  ;;  %p1842_p3 = scmp.lt.s32.totalorder %s1840_s18, %s1834_s7 }
  0xb2   : > { %1531 = vmatpush3.bf16.msra.mxu0 %v1528_v23  ;;  %1469 = vmatprep.subr.bf16.mxu1 %v1468_v31  ;;  %v2276_v44 = vld [vmem:[#allocation2 + $0x2] sm:$0xff]  ;;  %v2279_v0 = vld [vmem:[#allocation2 + $0xa] sm:$0xff]  ;;  %v444_v22 = vld [vmem:[#allocation8 + $0x50] sm:$0xff]  ;;  %p1836_p9 = pnand %p1835_p12, %p2441_p8 }
  0xb3   : > { %1533 = vmatprep.subr.bf16.mxu0 %v1532_v32  ;;  %1309 = vmatprep.mubr.f32.mxu1 %v450_v43  ;;  %v723_v6 = vld [vmem:[#allocation8 + $0x1a8] sm:$0xff]  ;;  %v715_v7 = vld [vmem:[#allocation2 + $0x3] sm:$0xff]  ;;  %v728_v24 = vld [vmem:[#allocation8 + $0x1d0] sm:$0xff]  ;;  %p1843_p13 = por %p1842_p3, %p1841_p5 }
  0xb4   : > { %1379 = vmatprep.mubr.f32.mxu0 %v2276_v44  ;;  %v1556_v9 = vpack.c.bf16 %v723_v6, %v722_v5  ;;  %v441_v11 = vld [vmem:[#allocation8 + $0x38] sm:$0xff]  ;;  %v442_v16 = vld [vmem:[#allocation8 + $0x40] sm:$0xff]  ;;  %v443_v17 = vld [vmem:[#allocation8 + $0x48] sm:$0xff]  ;;  %s2312_s19 = scalar_lea.hbm %s2440_s2, %s1180_s20  ;;  %p1837_p1 = pneg %p1836_p9 }
  0xb5   : > { %1471 = vmatpush3.bf16.msra.mxu1 %v1468_v31  ;;  %v725_v13 = vld [vmem:[#allocation8 + $0x1b8] sm:$0xff]  ;;  %v1496_v14 = vpack.c.bf16 %v441_v11, %v440_v10  ;;  %v726_v18 = vld [vmem:[#allocation8 + $0x1c0] sm:$0xff]  ;;  %v727_v19 = vld [vmem:[#allocation8 + $0x1c8] sm:$0xff]  ;;  %v1500_v20 = vpack.c.bf16 %v443_v17, %v442_v16 }
  0xb6   : > { %1535 = vmatpush3.bf16.msra.mxu0 %v1532_v32  ;;  %1473 = vmatprep.subr.bf16.mxu1 %v1472_v37  ;;  %v1560_v15 = vpack.c.bf16 %v725_v13, %v724_v12  ;;  %v1564_v21 = vpack.c.bf16 %v727_v19, %v726_v18  ;;  %v445_v23 = vld [vmem:[#allocation8 + $0x58] sm:$0xff]  ;;  %v446_v28 = vld [vmem:[#allocation8 + $0x60] sm:$0xff]  ;;  %v447_v30 = vld [vmem:[#allocation8 + $0x68] sm:$0xff]  ;;  %p1844_p6 = pnand %p1843_p13, %p1837_p1 }
  0xb7   : > { %1537 = vmatprep.subr.bf16.mxu0 %v1536_v38  ;;  %v729_v25 = vld [vmem:[#allocation8 + $0x1d8] sm:$0xff]  ;;  %v730_v31 = vld [vmem:[#allocation8 + $0x1e0] sm:$0xff]  ;;  %v731_v32 = vld [vmem:[#allocation8 + $0x1e8] sm:$0xff]  ;;  %v1508_v33 = vpack.c.bf16 %v447_v30, %v446_v28 }
  0xb8   : > { %v1568_v27 = vpack.c.bf16 %v729_v25, %v728_v24  ;;  %v1572_v34 = vpack.c.bf16 %v731_v32, %v730_v31  ;;  %v448_v35 = vld [vmem:[#allocation8 + $0x70] sm:$0xff]  ;;  %v449_v36 = vld [vmem:[#allocation8 + $0x78] sm:$0xff]  ;;  %v814_v41 = vld [vmem:[#allocation8 + $0x200] sm:$0xff] }
  0xb9   : > { %1475 = vmatpush3.bf16.msra.mxu1 %v1472_v37  ;;  %v732_v37 = vld [vmem:[#allocation8 + $0x1f0] sm:$0xff]  ;;  %v1512_v39 = vpack.c.bf16 %v449_v36, %v448_v35  ;;  %v815_v42 = vld [vmem:[#allocation8 + $0x208] sm:$0xff]  ;;  %v811_v49 = vld [vmem:[#allocation2 + $0x4] sm:$0xff] }
  0xba   : > { %1539 = vmatpush3.bf16.msra.mxu0 %v1536_v38  ;;  %1477 = vmatprep.subr.bf16.mxu1 %v1476_v45  ;;  %v733_v38 = vld [vmem:[#allocation8 + $0x1f8] sm:$0xff]  ;;  %v1580_v43 = vpack.c.bf16 %v815_v42, %v814_v41  ;;  %v716_v47 = vld [vmem:[#allocation2 + $0xb] sm:$0xff]  ;;  %v820_v53 = vld [vmem:[#allocation8 + $0x230] sm:$0xff] }
  0xbb   : > { %1541 = vmatprep.subr.bf16.mxu0 %v1540_v46  ;;  %v1576_v40 = vpack.c.bf16 %v733_v38, %v732_v37  ;;  %v818_v50 = vld [vmem:[#allocation8 + $0x220] sm:$0xff]  ;;  %v821_v54 = vld [vmem:[#allocation8 + $0x238] sm:$0xff]  ;;  %v824_v59 = vld [vmem:[#allocation8 + $0x250] sm:$0xff] }
  0xbc   : > { %v1592_v55 = vpack.c.bf16 %v821_v54, %v820_v53  ;;  %v822_v56 = vld [vmem:[#allocation8 + $0x240] sm:$0xff]  ;;  %v825_v60 = vld [vmem:[#allocation8 + $0x258] sm:$0xff]  ;;  %v827_v62 = vld [vmem:[#allocation8 + $0x268] sm:$0xff] }
  0xbd   : > { %1479 = vmatpush3.bf16.msra.mxu1 %v1476_v45  ;;  %v816_v45 = vld [vmem:[#allocation8 + $0x210] sm:$0xff]  ;;  %v826_v61 = vld [vmem:[#allocation8 + $0x260] sm:$0xff] }
  0xbe   : > { %1543 = vmatpush3.bf16.msra.mxu0 %v1540_v46  ;;  %1481 = vmatprep.subr.bf16.mxu1 %v1480_v51  ;;  %v817_v46 = vld [vmem:[#allocation8 + $0x218] sm:$0xff]  ;;  %v812_v4 = vld [vmem:[#allocation2 + $0xc] sm:$0xff] }
  0xbf   : > { %1545 = vmatprep.subr.bf16.mxu0 %v1544_v52  ;;  %v1584_v48 = vpack.c.bf16 %v817_v46, %v816_v45 }
  0xc1   : > { %1483 = vmatpush3.bf16.msra.mxu1 %v1480_v51  ;;  %v819_v51 = vld [vmem:[#allocation8 + $0x228] sm:$0xff] }
  0xc2   : > { %1547 = vmatpush3.bf16.msra.mxu0 %v1544_v52  ;;  %1485 = vmatprep.subr.bf16.mxu1 %v1484_v57  ;;  %v1588_v52 = vpack.c.bf16 %v819_v51, %v818_v50  ;;  %v1177_v50 = vld [vmem:[%s2438_s21] ss:$0 sm:$0xff] }
  0xc3   : > { %1549 = vmatprep.subr.bf16.mxu0 %v1548_v58 }
  0xc4   : > { %1310 = vmatmul.mubr.f32.vlgmr.msra.gmra.mrb[0].mxu1 %v451_v63  ;;  %v1604_v63 = vpack.c.bf16 %v827_v62, %v826_v61 }
  0xc5   : > { %1487 = vmatpush3.bf16.msra.mxu1 %v1484_v57  ;;  %1380 = vmatmul.mubr.f32.vlgmr.msra.gmra.mrb[0].mxu0 %v2279_v0  ;;  %v823_v57 = vld [vmem:[#allocation8 + $0x248] sm:$0xff] }
  0xc6   : > { %1551 = vmatpush3.bf16.msra.mxu0 %v1548_v58  ;;  %1489 = vmatprep.subr.bf16.mxu1 %v1488_v1  ;;  %v1596_v58 = vpack.c.bf16 %v823_v57, %v822_v56 }
  0xc7   : > { %1553 = vmatprep.subr.bf16.mxu0 %v1552_v2  ;;  %1344 = vmatprep.mubr.f32.mxu1 %v2267_v26  ;;  %v1504_v26 = vpack.c.bf16 %v445_v23, %v444_v22 }
  0xc8   : > { %1414 = vmatprep.mubr.f32.mxu0 %v715_v7 }
  0xc9   : > { %1491 = vmatpush3.bf16.msra.mxu1 %v1488_v1  ;;  %v828_v1 = vld [vmem:[#allocation8 + $0x270] sm:$0xff] }
  0xca   : > { %1555 = vmatpush3.bf16.msra.mxu0 %v1552_v2  ;;  %1493 = vmatprep.subr.bf16.mxu1 %v1492_v8  ;;  %v829_v2 = vld [vmem:[#allocation8 + $0x278] sm:$0xff] }
  0xcb   : > { %1557 = vmatprep.subr.bf16.mxu0 %v1556_v9  ;;  %v1608_v3 = vpack.c.bf16 %v829_v2, %v828_v1 }
  0xcd   : > { %1495 = vmatpush3.bf16.msra.mxu1 %v1492_v8  ;;  %v1175_v8 = vld [vmem:[%s2381_s4] ss:$0 sm:$0xff] }
  0xce   : > { %1559 = vmatpush3.bf16.msra.mxu0 %v1556_v9  ;;  %1497 = vmatprep.subr.bf16.mxu1 %v1496_v14 }
  0xcf   : > { %1561 = vmatprep.subr.bf16.mxu0 %v1560_v15 }
  0xd1   : > { %1499 = vmatpush3.bf16.msra.mxu1 %v1496_v14 }
  0xd2   : > { %1563 = vmatpush3.bf16.msra.mxu0 %v1560_v15  ;;  %1501 = vmatprep.subr.bf16.mxu1 %v1500_v20 }
  0xd3   : > { %1565 = vmatprep.subr.bf16.mxu0 %v1564_v21 }
  0xd5   : > { %1503 = vmatpush3.bf16.msra.mxu1 %v1500_v20 }
  0xd6   : > { %1567 = vmatpush3.bf16.msra.mxu0 %v1564_v21  ;;  %1505 = vmatprep.subr.bf16.mxu1 %v1504_v26 }
  0xd7   : > { %1569 = vmatprep.subr.bf16.mxu0 %v1568_v27 }
  0xd9   : > { %1507 = vmatpush3.bf16.msra.mxu1 %v1504_v26  ;;  %v1975_v26 = vmov 0  }
  0xda   : > { %1571 = vmatpush3.bf16.msra.mxu0 %v1568_v27  ;;  %1509 = vmatprep.subr.bf16.mxu1 %v1508_v33  ;;  %v936_v27 = vlaneseq }
  0xdb   : > { %1573 = vmatprep.subr.bf16.mxu0 %v1572_v34  ;;  %1740 = vset.pattern.permute.xlu1 %v1975_v26 }
  0xdc   : > { %1739 = vset.pattern.permute.xlu0 %v1975_v26  ;;  %v937_v31 = vand.u32 127, %v936_v27 }
  0xdd   : > { %1511 = vmatpush3.bf16.msra.mxu1 %v1508_v33 }
  0xde   : > { %1575 = vmatpush3.bf16.msra.mxu0 %v1572_v34  ;;  %1513 = vmatprep.subr.bf16.mxu1 %v1512_v39  ;;  %vm938_vm0 = vcmp.lt.s32.totalorder %v937_v31, 32 }
  0xdf   : > { %1577 = vmatprep.subr.bf16.mxu0 %v1576_v40 }
  0xe1   : > { %1515 = vmatpush3.bf16.msra.mxu1 %v1512_v39  ;;  %v976_v39 = vld [vmem:[%s423_s15 + $0x8] sm:$0xff] }
  0xe2   : > { %1579 = vmatpush3.bf16.msra.mxu0 %v1576_v40 }
  0xe3   : > { %1581 = vmatprep.subr.bf16.mxu0 %v1580_v43 }
  0xe4   : > { %1345 = vmatmul.mubr.f32.vlgmr.msra.gmra.mrb[0].mxu1 %v2270_v29  ;;  %v1600_v29 = vpack.c.bf16 %v825_v60, %v824_v59 }
  0xe5   : > { %1415 = vmatmul.mubr.f32.vlgmr.msra.gmra.mrb[0].mxu0 %v716_v47 }
  0xe6   : > { %1583 = vmatpush3.bf16.msra.mxu0 %v1580_v43  ;;  %1449 = vmatprep.mubr.f32.mxu0 %v811_v49 }
  0xe7   : > { %1585 = vmatprep.subr.bf16.mxu0 %v1584_v48 }
  0xea   : > { %1587 = vmatpush3.bf16.msra.mxu0 %v1584_v48  ;;  %v1176_v48 = vld [vmem:[%s2437_s17] ss:$0 sm:$0xff] }
  0xeb   : > { %1589 = vmatprep.subr.bf16.mxu0 %v1588_v52 }
  0xee   : > { %1591 = vmatpush3.bf16.msra.mxu0 %v1588_v52 }
  0xef   : > { %1593 = vmatprep.subr.bf16.mxu0 %v1592_v55 }
  0xf2   : > { %1595 = vmatpush3.bf16.msra.mxu0 %v1592_v55 }
  0xf3   : > { %1597 = vmatprep.subr.bf16.mxu0 %v1596_v58 }
  0xf6   : > { %1599 = vmatpush3.bf16.msra.mxu0 %v1596_v58 }
  0xf7   : > { %1601 = vmatprep.subr.bf16.mxu0 %v1600_v29 }
  0xfa   : > { %1603 = vmatpush3.bf16.msra.mxu0 %v1600_v29 }
  0xfb   : > { %1605 = vmatprep.subr.bf16.mxu0 %v1604_v63 }
  0xfe   : > { %1607 = vmatpush3.bf16.msra.mxu0 %v1604_v63 }
  0xff   : > { %1609 = vmatprep.subr.bf16.mxu0 %v1608_v3 }
 0x102   : > { %1611 = vmatpush3.bf16.msra.mxu0 %v1608_v3 }
 0x105   : > { %1450 = vmatmul.mubr.f32.vlgmr.msra.gmra.mrb[0].mxu0 %v812_v4 }
 0x1b7   : > { %v1346_v5 = vpop.f32.mrb[0].mxu1 }
 0x1b8   : > { %v610_v6 = vpop.f32.mrb[1].mxu1 }
 0x1d8   : > { %v1451_v7 = vpop.f32.mrb[0].mxu0 }
 0x1d9   : > { %v1612_v9 = vadd.f32 %v1451_v7, %v1346_v5  ;;  %v896_v10 = vpop.f32.mrb[1].mxu0 }
 0x1da   : > { %v1613_v11 = vadd.f32 %v896_v10, %v610_v6 }
 0x1db   : > { %v915_v12 = vadd.f32 %v1612_v9, %v1175_v8 }
 0x1dc   : > { %v914_v13 = vadd.f32 %v1613_v11, %v1175_v8 }
 0x1dd   : > { %v919_v14 = vmul.f32 0.70710677, %v915_v12  ;;  %v917_v21 = vmul.f32 0.5, %v915_v12 }
 0x1de   : > { %v918_v15 = vmul.f32 0.70710677, %v914_v13  ;;  %v916_v18 = vmul.f32 0.5, %v914_v13 }
 0x1df   : > { %1741 = verf.f32 %v919_v14 }
 0x1e0   : > { %1743 = verf.f32 %v918_v15 }
 0x1e9   : > { %v1742_v16 = vpop.eup %1741 }
 0x1ea   : > { %v1744_v17 = vpop.eup %1743  ;;  %v923_v20 = vadd.f32 1.0, %v1742_v16 }
 0x1eb   : > { %v922_v19 = vadd.f32 1.0, %v1744_v17 }
 0x1ec   : > { %v925_v24 = vmul.f32 %v923_v20, %v917_v21 }
 0x1ed   : > { %v924_v22 = vmul.f32 %v922_v19, %v916_v18 }
 0x1ee   : > { %v927_v25 = vadd.f32 %v925_v24, %v2279_v0 }
 0x1ef   : > { %v926_v23 = vadd.f32 %v924_v22, %v2276_v44  ;;  %v975_v44 = vld [vmem:[%s423_s15] sm:$0xff] }
 0x1f1   : > { %928 = vadd.xlane.f32.xlu0 %v926_v23 }
 0x1f5   : > { %930 = vadd.xlane.f32.xlu0 %v927_v25 }
 0x20b   : > { %979 = vperm.xlu0 %1739, %v975_v44  }
 0x27e   : > { %v929_v0 = vpop.xlane.xlu0 %928 }
 0x27f   : > { %v932_v28 = vmul.f32 0.03125, %v929_v0 }
 0x281   : > { %v934_v33 = vsub.f32 %v926_v23, %v932_v28 }
 0x282   : > { %v931_v30 = vpop.xlane.xlu0 %930 }
 0x283   : > { %v933_v32 = vmul.f32 0.03125, %v931_v30  ;;  %v941_v37 = vsel %vm938_vm0, %v934_v33, 0.0 }
 0x284   : > { %v943_v38 = vmul.f32 %v941_v37, %v941_v37 }
 0x285   : > { %v935_v34 = vsub.f32 %v927_v25, %v933_v32 }
 0x287   : > { %v942_v35 = vsel %vm938_vm0, %v935_v34, 0.0 }
 0x288   : > { %v944_v36 = vmul.f32 %v942_v35, %v942_v35 }
 0x28a   : > { %947 = vadd.xlane.f32.xlu1 %v944_v36  ;;  %v980_v58 = vpop.permute.xlu0 %979 }
 0x28e   : > { %945 = vadd.xlane.f32.xlu1 %v943_v38 }
 0x29f   : > { %984 = vperm.xlu1 %1740, %v976_v39  }
 0x317   : > { %v948_v40 = vpop.xlane.xlu1 %947 }
 0x318   : > { %v950_v41 = vmul.f32 0.03125, %v948_v40 }
 0x31a   : > { %v952_v42 = vadd.f32 1e-05, %v950_v41 }
 0x31b   : > { %v946_v43 = vpop.xlane.xlu1 %945 }
 0x31c   : > { %1745 = vrsqrt.f32 %v952_v42  ;;  %v949_v45 = vmul.f32 0.03125, %v946_v43 }
 0x31e   : > { %v951_v46 = vadd.f32 1e-05, %v949_v45 }
 0x31f   : > { %v985_v53 = vpop.permute.xlu1 %984 }
 0x320   : > { %1747 = vrsqrt.f32 %v951_v46 }
 0x326   : > { %v1746_v47 = vpop.eup %1745 }
 0x327   : > { %v956_v49 = vmul.f32 %v1746_v47, %v935_v34 }
 0x329   : > { %v965_v51 = vmul.f32 %v1176_v48, %v956_v49 }
 0x32a   : > { %v1748_v52 = vpop.eup %1747 }
 0x32b   : > { %v974_v54 = vadd.f32 %v1177_v50, %v965_v51  ;;  %v955_v55 = vmul.f32 %v1748_v52, %v934_v33 }
 0x32d   : > { %v988_v56 = vmul.f32 %v985_v53, %v974_v54  ;;  %v964_v57 = vmul.f32 %v1176_v48, %v955_v55 }
 0x32f   : > { %990 = vst [vmem:[%s407_s13 + $0x8] sm:$0xff] %v988_v56  ;;  %v973_v59 = vadd.f32 %v1177_v50, %v964_v57 }
 0x331   : > { %v987_v60 = vmul.f32 %v980_v58, %v973_v59 }
 0x333   : > { %989 = vst [vmem:[%s407_s13] sm:$0xff] %v987_v60 }
 0x334   : > { %1847 = shalt.err (!%p1844_p6)
}
 0x335   : > { %s1848_s15 = scalar_lea.hbm %s2312_s19, 256  ;;  %s1852_s6 = scalar_lea.hbm %s2440_s2, 1536 }
 0x336   : > { %p1849_p0 = scmp.ne.s32.totalorder %s2312_s19, %s1848_s15  ;;  %p1853_p2 = scmp.lt.u32.totalorder %s2312_s19, %s2440_s2 }
 0x337   : > { %p1854_p10 = scmp.lt.u32.totalorder %s1852_s6, %s1848_s15  ;;  %p1856_p12 = scmp.lt.u32.totalorder %s1848_s15, %s2312_s19 }
 0x338   : > { %p1850_p11 = pnand %p1849_p0, %p2441_p8 }
 0x339   : > { %p1855_p7 = por %p1854_p10, %p1853_p2 }
 0x33a   : > { %p1851_p4 = pneg %p1850_p11 }
 0x33b   : > { %p1857_p9 = por %p1856_p12, %p1855_p7 }
 0x33d   : > { %p1858_p1 = pnand %p1857_p9, %p1851_p4 }
 0x33f   : > { %1861 = shalt.err (!%p1858_p1)
}
 0x340   : > { %s1977_s23 = smov 128   ;;  %s1978_s21 = smov 8  }
 0x341   : > { %1630 = dma.vmem_to_hbm [thread:$0]  (%p2441_p8), %s2314_s29, 256, %s2312_s19, %s992_s3, %s1977_s23, %s1977_s23, %s1978_s21  }
 0x342 PF: > { %s2442_s22 = sld [smem:[#allocation14_spill]]  ;;  %s2443_s20 = sld [smem:[#allocation23_spill]] }
 0x343   : > { %p1642_p5 = scmp.ge.s32.totalorder %s1966_s11, 2 }
 0x348   : > { %s1022_s13 = sand.u32 1, %s2442_s22   ;;  %p2444_p3 = scmp.ne.s32.totalorder %s2443_s20, 0 }
 0x349   : > { %s1023_s8 = scalar_lea.sflag [#allocation5], %s1022_s13 }
 0x34a   : > { %p1637_p13 = pnand %p1642_p5, %p2444_p3 }
 0x34c   : > { %1919 = dma.done.wait (!%p1637_p13), %s1023_s8, 256  }
 0x34d   : > { %1921 = vsyncadd (!%p1637_p13), %s1023_s8, 4294967040  ;;  %s26_s11 = sadd.s32 1, %s1966_s11   ;;  %s2445_s9 = sld [smem:[#allocation21_spill]] }
 0x34e   : > { %p23_p6 = scmp.ge.s32.totalorder %s26_s11, 8   ;;  %s2446_s12 = sld [smem:[#allocation15_spill]] }
 0x34f   : > { %s2447_s29 = sld [smem:[#allocation20_spill]]  ;;  %s2448_s30 = sld [smem:[#allocation17_spill]] }
 0x350   : > { %s2449_s19 = sld [smem:[#allocation18_spill]]  ;;  %s2450_s3 = sld [smem:[#allocation19_spill]] }
 0x351   : > { %s2451_s24 = smov %s1930_s25  ;;  %s2452_s25 = smov %s1934_s26 }
 0x352   : > { %s2454_s27 = smov %s1942_s28  ;;  %s2456_s8 = smov %s1962_s10 }
 0x353   : > { %s2453_s26 = smov %s2445_s9  ;;  %25 = sbr.rel (!%p23_p6) target bundleno = 17 (0x11), region = 117 }
 0x354   : > { %s2455_s28 = smov %s2446_s12 }
 0x356   : > { %s2457_s9 = smov %s2449_s19  ;;  %s2458_s10 = smov %s2450_s3 }
 0x35a   :  { %1028 = vsyncpa [#allocation4], 1 }
 0x35b   :  { %1030 = vsyncpa [#allocation4 + $0x1], 1 }
 0x35c   :  { %1031 = vsyncpa [#allocation7], 1 }
 0x35d   :  { %1033 = vsyncpa [#allocation7 + $0x1], 1 }
 0x35e   :  { %1034 = vsyncpa [#allocation5], 1 }
 0x35f   :  { %1036 = vsyncpa [#allocation5 + $0x1], 1 }

</bundles_post_ra>
